<compile_context>
chip_gen: v5e
topology: v5e:2x2
jax: 0.10.0
libtpu: 0.0.40
codegen_flags: <defaults>
</compile_context>

<pallas_src>
import math

import jax
import jax.numpy as jnp
from jax.experimental import pallas as pl
from jax.experimental.pallas import tpu as pltpu


# --------------------------------------------------------------------------
# Sinusoidal table (init-time, matches the PyTorch buffer exactly)
# --------------------------------------------------------------------------
def make_sinusoidal_table(d_model, max_len=5000, dtype=jnp.float32):
    position = jnp.arange(max_len, dtype=jnp.float32)[:, None]          # (L, 1)
    div_term = jnp.exp(
        jnp.arange(0, d_model, 2, dtype=jnp.float32)
        * (-math.log(10000.0) / d_model))                               # (D/2,)
    angles = position * div_term                                        # (L, D/2)
    pe = jnp.zeros((max_len, d_model), dtype=jnp.float32)
    pe = pe.at[:, 0::2].set(jnp.sin(angles))
    pe = pe.at[:, 1::2].set(jnp.cos(angles))
    return pe[:, None, :].astype(dtype)                                 # (L, 1, D)


# --------------------------------------------------------------------------
# Kernel: one sequence-tile of   out = x + pe   (pe broadcast over batch)
# --------------------------------------------------------------------------
def _add_pe_kernel(x_ref, pe_ref, o_ref):
    # x_ref : (tile_s, B, D)   pe_ref: (tile_s, 1, D)   o_ref: (tile_s, B, D)
    o_ref[...] = x_ref[...] + pe_ref[...]


def positional_encoding_forward(x, pe, *, tile_s=None,
                                vmem_block_bytes=2 * 1024 * 1024):
    """x: (S, B, D) float array.  pe: (max_len, 1, D) table.  Returns (S, B, D)."""
    S, B, D = x.shape
    assert pe.shape[0] >= S and pe.shape[1] == 1 and pe.shape[2] == D, pe.shape

    # Slice the table to the live rows (== pe[:x.size(0), :]) and match x dtype.
    pe_s = jax.lax.slice(pe, (0, 0, 0), (S, 1, D)).astype(x.dtype)

    # Row-tile over the sequence axis: pick the largest tile that keeps one
    # x block around `vmem_block_bytes` (Pallas double-buffers each operand).
    if tile_s is None:
        row_bytes = B * D * x.dtype.itemsize
        tile_s = max(1, vmem_block_bytes // max(row_bytes, 1))
    tile_s = int(min(tile_s, S))
    if tile_s < S:
        tile_s = max(8, (tile_s // 8) * 8)   # keep tiles sublane-friendly

    grid = (pl.cdiv(S, tile_s),)

    return pl.pallas_call(
        _add_pe_kernel,
        grid=grid,
        in_specs=[
            pl.BlockSpec((tile_s, B, D), lambda i: (i, 0, 0)),   # x tile
            pl.BlockSpec((tile_s, 1, D), lambda i: (i, 0, 0)),   # pe rows
        ],
        out_specs=pl.BlockSpec((tile_s, B, D), lambda i: (i, 0, 0)),
        out_shape=jax.ShapeDtypeStruct((S, B, D), x.dtype),
        compiler_params=pltpu.CompilerParams(
            dimension_semantics=("parallel",)),
    )(x, pe_s)


# --------------------------------------------------------------------------
# Demo / self-check
# --------------------------------------------------------------------------
if __name__ == "__main__":
    key = jax.random.PRNGKey(0)
    S, B, D = 64, 2, 32            # (seq, batch, d_model) — small demo shapes
    MAX_LEN = 5000

    x = jax.random.normal(key, (S, B, D), dtype=jnp.float32)
    pe = make_sinusoidal_table(D, MAX_LEN)

    # Default (auto) tiling.
    out = jax.block_until_ready(positional_encoding_forward(x, pe))

    ref = x + pe[:S]               # eval-mode reference (dropout = identity)
    assert out.shape == (S, B, D), out.shape
    assert bool(jnp.all(jnp.isfinite(out)))
    assert bool(jnp.allclose(out, ref, atol=1e-6, rtol=1e-6))

    # Multi-block path: explicit small tile exercises the pipelined seq grid.
    out_tiled = jax.block_until_ready(
        positional_encoding_forward(x, pe, tile_s=16))
    assert bool(jnp.allclose(out_tiled, ref, atol=1e-6, rtol=1e-6))

    print("KERNEL_OK")
</pallas_src>

<mosaic_0001>
module attributes {stable_mosaic.version = 11 : i64} {
  func.func @_add_pe_kernel(%arg0: i32, %arg1: memref<64x2x32xf32, #tpu.memory_space<vmem>>, %arg2: memref<64x1x32xf32, #tpu.memory_space<vmem>>, %arg3: memref<64x2x32xf32, #tpu.memory_space<vmem>>) attributes {dimension_semantics = [#tpu.dimension_semantics<parallel>], iteration_bounds = array<i64: 1>, scalar_prefetch = 0 : i64, scratch_operands = 0 : i64, tpu.core_type = #tpu.core_type<tc>, window_params = [{transform_indices = @transform_0, window_bounds = array<i64: 64, 2, 32>}, {transform_indices = @transform_1, window_bounds = array<i64: 64, 1, 32>}, {transform_indices = @transform_2, window_bounds = array<i64: 64, 2, 32>}]} {
    %c0 = arith.constant 0 : index
    %c0_0 = arith.constant 0 : index
    %c0_1 = arith.constant 0 : index
    %0 = vector.load %arg1[%c0, %c0_0, %c0_1] : memref<64x2x32xf32, #tpu.memory_space<vmem>>, vector<64x2x32xf32>
    %c0_2 = arith.constant 0 : index
    %c0_3 = arith.constant 0 : index
    %c0_4 = arith.constant 0 : index
    %1 = vector.load %arg2[%c0_2, %c0_3, %c0_4] : memref<64x1x32xf32, #tpu.memory_space<vmem>>, vector<64x1x32xf32>
    %2 = vector.broadcast %1 : vector<64x1x32xf32> to vector<64x2x32xf32>
    %3 = arith.addf %0, %2 : vector<64x2x32xf32>
    %c0_5 = arith.constant 0 : index
    %c0_6 = arith.constant 0 : index
    %c0_7 = arith.constant 0 : index
    %4 = vector.load %arg3[%c0_5, %c0_6, %c0_7] : memref<64x2x32xf32, #tpu.memory_space<vmem>>, vector<64x2x32xf32>
    tpu.vector_store %arg3[%c0_5, %c0_6, %c0_7], %3 {strides = array<i32>} : memref<64x2x32xf32, #tpu.memory_space<vmem>>, vector<64x2x32xf32>,
    return
  }
  func.func @transform_0(%arg0: i32) -> (i32, i32, i32) {
    %c0_i32 = arith.constant 0 : i32
    %c0_i32_0 = arith.constant 0 : i32
    %c0_i32_1 = arith.constant 0 : i32
    return %arg0, %c0_i32, %c0_i32_0 : i32, i32, i32
  }
  func.func @transform_1(%arg0: i32) -> (i32, i32, i32) {
    %c0_i32 = arith.constant 0 : i32
    %c0_i32_0 = arith.constant 0 : i32
    %c0_i32_1 = arith.constant 0 : i32
    return %arg0, %c0_i32, %c0_i32_0 : i32, i32, i32
  }
  func.func @transform_2(%arg0: i32) -> (i32, i32, i32) {
    %c0_i32 = arith.constant 0 : i32
    %c0_i32_0 = arith.constant 0 : i32
    %c0_i32_1 = arith.constant 0 : i32
    return %arg0, %c0_i32, %c0_i32_0 : i32, i32, i32
  }
}

</mosaic_0001>

<bundles_post_ra>
// kernel: tpu_custom_call.1
= control target key start
LH: loop header
LB: loop body
LE: loop exit
PB: predicated region body
PF: predicated region fallthrough
CT: control target
= control target key end

     0   :  { %vm395_vm0 = vcmask 254976   ;;  %s1183_s0 = inlined_call_operand.vmem [shape: f32[64,2,32], index: 0, kind: input, shape index: {}]   ;;  %s1184_s1 = inlined_call_operand.vmem [shape: f32[64,1,32], index: 1, kind: input, shape index: {}]   ;;  %s1185_s2 = inlined_call_operand.vmem [shape: f32[64,2,32], index: 2, kind: output, shape index: {}]  }
   0x1   :  { %v11_v0 = vld [vmem:[%s1183_s0] sm:$0x3]  ;;  %v12_v2 = vld [vmem:[%s1183_s0 + $0x2] sm:$0x3]  ;;  %v13_v5 = vld [vmem:[%s1183_s0 + $0x4] sm:$0x3] }
   0x2   :  { %v464_v1 = vld [vmem:[%s1184_s1] ss:$0 sm:$0xff]  ;;  %v465_v3 = vld [vmem:[%s1184_s1 + $0x1] ss:$0 sm:$0xff]  ;;  %v466_v6 = vld [vmem:[%s1184_s1 + $0x2] ss:$0 sm:$0xff] }
   0x3   :  { %v331_v4 = vadd.f32 %v464_v1, %v11_v0  ;;  %v332_v7 = vadd.f32 %v465_v3, %v12_v2  ;;  %v14_v8 = vld [vmem:[%s1183_s0 + $0x6] sm:$0x3]  ;;  %v467_v9 = vld [vmem:[%s1184_s1 + $0x3] ss:$0 sm:$0xff]  ;;  %v333_v10 = vadd.f32 %v466_v6, %v13_v5  ;;  %v15_v11 = vld [vmem:[%s1183_s0 + $0x8] sm:$0x3] }
   0x4   :  { %v334_v12 = vadd.f32 %v467_v9, %v14_v8  ;;  %v468_v13 = vld [vmem:[%s1184_s1 + $0x4] ss:$0 sm:$0xff]  ;;  %v16_v14 = vld [vmem:[%s1183_s0 + $0xa] sm:$0x3]  ;;  %v469_v15 = vld [vmem:[%s1184_s1 + $0x5] ss:$0 sm:$0xff] }
   0x5   :  { %396 = vst.msk [vmem:[%s1185_s2] sm:$0x3] %vm395_vm0, %v331_v4  ;;  %v335_v16 = vadd.f32 %v468_v13, %v15_v11  ;;  %v17_v17 = vld [vmem:[%s1183_s0 + $0xc] sm:$0x3]  ;;  %v336_v18 = vadd.f32 %v469_v15, %v16_v14  ;;  %v470_v19 = vld [vmem:[%s1184_s1 + $0x6] ss:$0 sm:$0xff] }
   0x6   :  { %397 = vst.msk [vmem:[%s1185_s2 + $0x2] sm:$0x3] %vm395_vm0, %v332_v7  ;;  %v18_v20 = vld [vmem:[%s1183_s0 + $0xe] sm:$0x3]  ;;  %v471_v21 = vld [vmem:[%s1184_s1 + $0x7] ss:$0 sm:$0xff]  ;;  %v337_v23 = vadd.f32 %v470_v19, %v17_v17 }
   0x7   :  { %398 = vst.msk [vmem:[%s1185_s2 + $0x4] sm:$0x3] %vm395_vm0, %v333_v10  ;;  %v19_v22 = vld [vmem:[%s1183_s0 + $0x10] sm:$0x3]  ;;  %v472_v24 = vld [vmem:[%s1184_s1 + $0x8] ss:$0 sm:$0xff]  ;;  %v338_v25 = vadd.f32 %v471_v21, %v18_v20 }
   0x8   :  { %399 = vst.msk [vmem:[%s1185_s2 + $0x6] sm:$0x3] %vm395_vm0, %v334_v12  ;;  %v20_v26 = vld [vmem:[%s1183_s0 + $0x12] sm:$0x3]  ;;  %v473_v27 = vld [vmem:[%s1184_s1 + $0x9] ss:$0 sm:$0xff]  ;;  %v339_v28 = vadd.f32 %v472_v24, %v19_v22 }
   0x9   :  { %400 = vst.msk [vmem:[%s1185_s2 + $0x8] sm:$0x3] %vm395_vm0, %v335_v16  ;;  %v21_v29 = vld [vmem:[%s1183_s0 + $0x14] sm:$0x3]  ;;  %v340_v30 = vadd.f32 %v473_v27, %v20_v26  ;;  %v474_v31 = vld [vmem:[%s1184_s1 + $0xa] ss:$0 sm:$0xff] }
   0xa   :  { %401 = vst.msk [vmem:[%s1185_s2 + $0xa] sm:$0x3] %vm395_vm0, %v336_v18  ;;  %v22_v32 = vld [vmem:[%s1183_s0 + $0x16] sm:$0x3]  ;;  %v475_v33 = vld [vmem:[%s1184_s1 + $0xb] ss:$0 sm:$0xff]  ;;  %v341_v34 = vadd.f32 %v474_v31, %v21_v29 }
   0xb   :  { %402 = vst.msk [vmem:[%s1185_s2 + $0xc] sm:$0x3] %vm395_vm0, %v337_v23  ;;  %v23_v35 = vld [vmem:[%s1183_s0 + $0x18] sm:$0x3]  ;;  %v342_v36 = vadd.f32 %v475_v33, %v22_v32  ;;  %v476_v37 = vld [vmem:[%s1184_s1 + $0xc] ss:$0 sm:$0xff] }
   0xc   :  { %403 = vst.msk [vmem:[%s1185_s2 + $0xe] sm:$0x3] %vm395_vm0, %v338_v25  ;;  %v24_v38 = vld [vmem:[%s1183_s0 + $0x1a] sm:$0x3]  ;;  %v477_v39 = vld [vmem:[%s1184_s1 + $0xd] ss:$0 sm:$0xff]  ;;  %v343_v41 = vadd.f32 %v476_v37, %v23_v35 }
   0xd   :  { %404 = vst.msk [vmem:[%s1185_s2 + $0x10] sm:$0x3] %vm395_vm0, %v339_v28  ;;  %v25_v40 = vld [vmem:[%s1183_s0 + $0x1c] sm:$0x3]  ;;  %v478_v42 = vld [vmem:[%s1184_s1 + $0xe] ss:$0 sm:$0xff]  ;;  %v344_v43 = vadd.f32 %v477_v39, %v24_v38 }
   0xe   :  { %405 = vst.msk [vmem:[%s1185_s2 + $0x12] sm:$0x3] %vm395_vm0, %v340_v30  ;;  %v26_v44 = vld [vmem:[%s1183_s0 + $0x1e] sm:$0x3]  ;;  %v479_v45 = vld [vmem:[%s1184_s1 + $0xf] ss:$0 sm:$0xff]  ;;  %v345_v46 = vadd.f32 %v478_v42, %v25_v40 }
   0xf   :  { %406 = vst.msk [vmem:[%s1185_s2 + $0x14] sm:$0x3] %vm395_vm0, %v341_v34  ;;  %v27_v47 = vld [vmem:[%s1183_s0 + $0x20] sm:$0x3]  ;;  %v346_v48 = vadd.f32 %v479_v45, %v26_v44  ;;  %v480_v49 = vld [vmem:[%s1184_s1 + $0x10] ss:$0 sm:$0xff] }
  0x10   :  { %407 = vst.msk [vmem:[%s1185_s2 + $0x16] sm:$0x3] %vm395_vm0, %v342_v36  ;;  %v28_v50 = vld [vmem:[%s1183_s0 + $0x22] sm:$0x3]  ;;  %v481_v51 = vld [vmem:[%s1184_s1 + $0x11] ss:$0 sm:$0xff]  ;;  %v347_v52 = vadd.f32 %v480_v49, %v27_v47 }
  0x11   :  { %408 = vst.msk [vmem:[%s1185_s2 + $0x18] sm:$0x3] %vm395_vm0, %v343_v41  ;;  %v29_v53 = vld [vmem:[%s1183_s0 + $0x24] sm:$0x3]  ;;  %v348_v54 = vadd.f32 %v481_v51, %v28_v50  ;;  %v482_v55 = vld [vmem:[%s1184_s1 + $0x12] ss:$0 sm:$0xff] }
  0x12   :  { %409 = vst.msk [vmem:[%s1185_s2 + $0x1a] sm:$0x3] %vm395_vm0, %v344_v43  ;;  %v30_v56 = vld [vmem:[%s1183_s0 + $0x26] sm:$0x3]  ;;  %v483_v57 = vld [vmem:[%s1184_s1 + $0x13] ss:$0 sm:$0xff]  ;;  %v349_v59 = vadd.f32 %v482_v55, %v29_v53 }
  0x13   :  { %410 = vst.msk [vmem:[%s1185_s2 + $0x1c] sm:$0x3] %vm395_vm0, %v345_v46  ;;  %v31_v58 = vld [vmem:[%s1183_s0 + $0x28] sm:$0x3]  ;;  %v484_v60 = vld [vmem:[%s1184_s1 + $0x14] ss:$0 sm:$0xff]  ;;  %v350_v61 = vadd.f32 %v483_v57, %v30_v56 }
  0x14   :  { %411 = vst.msk [vmem:[%s1185_s2 + $0x1e] sm:$0x3] %vm395_vm0, %v346_v48  ;;  %v32_v62 = vld [vmem:[%s1183_s0 + $0x2a] sm:$0x3]  ;;  %v485_v63 = vld [vmem:[%s1184_s1 + $0x15] ss:$0 sm:$0xff]  ;;  %v351_v0 = vadd.f32 %v484_v60, %v31_v58 }
  0x15   :  { %412 = vst.msk [vmem:[%s1185_s2 + $0x20] sm:$0x3] %vm395_vm0, %v347_v52  ;;  %v33_v1 = vld [vmem:[%s1183_s0 + $0x2c] sm:$0x3]  ;;  %v352_v2 = vadd.f32 %v485_v63, %v32_v62  ;;  %v486_v3 = vld [vmem:[%s1184_s1 + $0x16] ss:$0 sm:$0xff] }
  0x16   :  { %413 = vst.msk [vmem:[%s1185_s2 + $0x22] sm:$0x3] %vm395_vm0, %v348_v54  ;;  %v34_v4 = vld [vmem:[%s1183_s0 + $0x2e] sm:$0x3]  ;;  %v487_v5 = vld [vmem:[%s1184_s1 + $0x17] ss:$0 sm:$0xff]  ;;  %v353_v6 = vadd.f32 %v486_v3, %v33_v1 }
  0x17   :  { %414 = vst.msk [vmem:[%s1185_s2 + $0x24] sm:$0x3] %vm395_vm0, %v349_v59  ;;  %v35_v7 = vld [vmem:[%s1183_s0 + $0x30] sm:$0x3]  ;;  %v354_v8 = vadd.f32 %v487_v5, %v34_v4  ;;  %v488_v9 = vld [vmem:[%s1184_s1 + $0x18] ss:$0 sm:$0xff] }
  0x18   :  { %415 = vst.msk [vmem:[%s1185_s2 + $0x26] sm:$0x3] %vm395_vm0, %v350_v61  ;;  %v36_v10 = vld [vmem:[%s1183_s0 + $0x32] sm:$0x3]  ;;  %v489_v11 = vld [vmem:[%s1184_s1 + $0x19] ss:$0 sm:$0xff]  ;;  %v355_v13 = vadd.f32 %v488_v9, %v35_v7 }
  0x19   :  { %416 = vst.msk [vmem:[%s1185_s2 + $0x28] sm:$0x3] %vm395_vm0, %v351_v0  ;;  %v37_v12 = vld [vmem:[%s1183_s0 + $0x34] sm:$0x3]  ;;  %v490_v14 = vld [vmem:[%s1184_s1 + $0x1a] ss:$0 sm:$0xff]  ;;  %v356_v15 = vadd.f32 %v489_v11, %v36_v10 }
  0x1a   :  { %417 = vst.msk [vmem:[%s1185_s2 + $0x2a] sm:$0x3] %vm395_vm0, %v352_v2  ;;  %v38_v16 = vld [vmem:[%s1183_s0 + $0x36] sm:$0x3]  ;;  %v491_v17 = vld [vmem:[%s1184_s1 + $0x1b] ss:$0 sm:$0xff]  ;;  %v357_v18 = vadd.f32 %v490_v14, %v37_v12 }
  0x1b   :  { %418 = vst.msk [vmem:[%s1185_s2 + $0x2c] sm:$0x3] %vm395_vm0, %v353_v6  ;;  %v39_v19 = vld [vmem:[%s1183_s0 + $0x38] sm:$0x3]  ;;  %v358_v20 = vadd.f32 %v491_v17, %v38_v16  ;;  %v492_v21 = vld [vmem:[%s1184_s1 + $0x1c] ss:$0 sm:$0xff] }
  0x1c   :  { %419 = vst.msk [vmem:[%s1185_s2 + $0x2e] sm:$0x3] %vm395_vm0, %v354_v8  ;;  %v40_v22 = vld [vmem:[%s1183_s0 + $0x3a] sm:$0x3]  ;;  %v493_v23 = vld [vmem:[%s1184_s1 + $0x1d] ss:$0 sm:$0xff]  ;;  %v359_v24 = vadd.f32 %v492_v21, %v39_v19 }
  0x1d   :  { %420 = vst.msk [vmem:[%s1185_s2 + $0x30] sm:$0x3] %vm395_vm0, %v355_v13  ;;  %v41_v25 = vld [vmem:[%s1183_s0 + $0x3c] sm:$0x3]  ;;  %v360_v26 = vadd.f32 %v493_v23, %v40_v22  ;;  %v494_v27 = vld [vmem:[%s1184_s1 + $0x1e] ss:$0 sm:$0xff] }
  0x1e   :  { %421 = vst.msk [vmem:[%s1185_s2 + $0x32] sm:$0x3] %vm395_vm0, %v356_v15  ;;  %v42_v28 = vld [vmem:[%s1183_s0 + $0x3e] sm:$0x3]  ;;  %v43_v30 = vld [vmem:[%s1183_s0 + $0x40] sm:$0x3]  ;;  %v361_v31 = vadd.f32 %v494_v27, %v41_v25 }
  0x1f   :  { %422 = vst.msk [vmem:[%s1185_s2 + $0x34] sm:$0x3] %vm395_vm0, %v357_v18  ;;  %v495_v29 = vld [vmem:[%s1184_s1 + $0x1f] ss:$0 sm:$0xff]  ;;  %v496_v32 = vld [vmem:[%s1184_s1 + $0x20] ss:$0 sm:$0xff] }
  0x20   :  { %423 = vst.msk [vmem:[%s1185_s2 + $0x36] sm:$0x3] %vm395_vm0, %v358_v20  ;;  %v362_v33 = vadd.f32 %v495_v29, %v42_v28  ;;  %v44_v34 = vld [vmem:[%s1183_s0 + $0x42] sm:$0x3]  ;;  %v497_v35 = vld [vmem:[%s1184_s1 + $0x21] ss:$0 sm:$0xff]  ;;  %v363_v36 = vadd.f32 %v496_v32, %v43_v30 }
  0x21   :  { %424 = vst.msk [vmem:[%s1185_s2 + $0x38] sm:$0x3] %vm395_vm0, %v359_v24  ;;  %v45_v37 = vld [vmem:[%s1183_s0 + $0x44] sm:$0x3]  ;;  %v364_v38 = vadd.f32 %v497_v35, %v44_v34  ;;  %v498_v39 = vld [vmem:[%s1184_s1 + $0x22] ss:$0 sm:$0xff] }
  0x22   :  { %425 = vst.msk [vmem:[%s1185_s2 + $0x3a] sm:$0x3] %vm395_vm0, %v360_v26  ;;  %v46_v40 = vld [vmem:[%s1183_s0 + $0x46] sm:$0x3]  ;;  %v499_v41 = vld [vmem:[%s1184_s1 + $0x23] ss:$0 sm:$0xff]  ;;  %v365_v42 = vadd.f32 %v498_v39, %v45_v37 }
  0x23   :  { %426 = vst.msk [vmem:[%s1185_s2 + $0x3c] sm:$0x3] %vm395_vm0, %v361_v31  ;;  %v47_v43 = vld [vmem:[%s1183_s0 + $0x48] sm:$0x3]  ;;  %v366_v44 = vadd.f32 %v499_v41, %v46_v40  ;;  %v500_v45 = vld [vmem:[%s1184_s1 + $0x24] ss:$0 sm:$0xff] }
  0x24   :  { %427 = vst.msk [vmem:[%s1185_s2 + $0x3e] sm:$0x3] %vm395_vm0, %v362_v33  ;;  %v48_v46 = vld [vmem:[%s1183_s0 + $0x4a] sm:$0x3]  ;;  %v501_v47 = vld [vmem:[%s1184_s1 + $0x25] ss:$0 sm:$0xff]  ;;  %v367_v49 = vadd.f32 %v500_v45, %v47_v43 }
  0x25   :  { %428 = vst.msk [vmem:[%s1185_s2 + $0x40] sm:$0x3] %vm395_vm0, %v363_v36  ;;  %v49_v48 = vld [vmem:[%s1183_s0 + $0x4c] sm:$0x3]  ;;  %v502_v50 = vld [vmem:[%s1184_s1 + $0x26] ss:$0 sm:$0xff]  ;;  %v368_v51 = vadd.f32 %v501_v47, %v48_v46 }
  0x26   :  { %429 = vst.msk [vmem:[%s1185_s2 + $0x42] sm:$0x3] %vm395_vm0, %v364_v38  ;;  %v50_v52 = vld [vmem:[%s1183_s0 + $0x4e] sm:$0x3]  ;;  %v503_v53 = vld [vmem:[%s1184_s1 + $0x27] ss:$0 sm:$0xff]  ;;  %v369_v54 = vadd.f32 %v502_v50, %v49_v48 }
  0x27   :  { %430 = vst.msk [vmem:[%s1185_s2 + $0x44] sm:$0x3] %vm395_vm0, %v365_v42  ;;  %v51_v55 = vld [vmem:[%s1183_s0 + $0x50] sm:$0x3]  ;;  %v370_v56 = vadd.f32 %v503_v53, %v50_v52  ;;  %v504_v57 = vld [vmem:[%s1184_s1 + $0x28] ss:$0 sm:$0xff] }
  0x28   :  { %431 = vst.msk [vmem:[%s1185_s2 + $0x46] sm:$0x3] %vm395_vm0, %v366_v44  ;;  %v52_v58 = vld [vmem:[%s1183_s0 + $0x52] sm:$0x3]  ;;  %v505_v59 = vld [vmem:[%s1184_s1 + $0x29] ss:$0 sm:$0xff]  ;;  %v371_v60 = vadd.f32 %v504_v57, %v51_v55 }
  0x29   :  { %432 = vst.msk [vmem:[%s1185_s2 + $0x48] sm:$0x3] %vm395_vm0, %v367_v49  ;;  %v53_v61 = vld [vmem:[%s1183_s0 + $0x54] sm:$0x3]  ;;  %v372_v62 = vadd.f32 %v505_v59, %v52_v58  ;;  %v506_v63 = vld [vmem:[%s1184_s1 + $0x2a] ss:$0 sm:$0xff] }
  0x2a   :  { %433 = vst.msk [vmem:[%s1185_s2 + $0x4a] sm:$0x3] %vm395_vm0, %v368_v51  ;;  %v54_v0 = vld [vmem:[%s1183_s0 + $0x56] sm:$0x3]  ;;  %v507_v1 = vld [vmem:[%s1184_s1 + $0x2b] ss:$0 sm:$0xff]  ;;  %v373_v3 = vadd.f32 %v506_v63, %v53_v61 }
  0x2b   :  { %434 = vst.msk [vmem:[%s1185_s2 + $0x4c] sm:$0x3] %vm395_vm0, %v369_v54  ;;  %v55_v2 = vld [vmem:[%s1183_s0 + $0x58] sm:$0x3]  ;;  %v508_v4 = vld [vmem:[%s1184_s1 + $0x2c] ss:$0 sm:$0xff]  ;;  %v374_v5 = vadd.f32 %v507_v1, %v54_v0 }
  0x2c   :  { %435 = vst.msk [vmem:[%s1185_s2 + $0x4e] sm:$0x3] %vm395_vm0, %v370_v56  ;;  %v56_v6 = vld [vmem:[%s1183_s0 + $0x5a] sm:$0x3]  ;;  %v509_v7 = vld [vmem:[%s1184_s1 + $0x2d] ss:$0 sm:$0xff]  ;;  %v375_v8 = vadd.f32 %v508_v4, %v55_v2 }
  0x2d   :  { %436 = vst.msk [vmem:[%s1185_s2 + $0x50] sm:$0x3] %vm395_vm0, %v371_v60  ;;  %v57_v9 = vld [vmem:[%s1183_s0 + $0x5c] sm:$0x3]  ;;  %v376_v10 = vadd.f32 %v509_v7, %v56_v6  ;;  %v510_v11 = vld [vmem:[%s1184_s1 + $0x2e] ss:$0 sm:$0xff] }
  0x2e   :  { %437 = vst.msk [vmem:[%s1185_s2 + $0x52] sm:$0x3] %vm395_vm0, %v372_v62  ;;  %v58_v12 = vld [vmem:[%s1183_s0 + $0x5e] sm:$0x3]  ;;  %v511_v13 = vld [vmem:[%s1184_s1 + $0x2f] ss:$0 sm:$0xff]  ;;  %v377_v14 = vadd.f32 %v510_v11, %v57_v9 }
  0x2f   :  { %438 = vst.msk [vmem:[%s1185_s2 + $0x54] sm:$0x3] %vm395_vm0, %v373_v3  ;;  %v59_v15 = vld [vmem:[%s1183_s0 + $0x60] sm:$0x3]  ;;  %v378_v16 = vadd.f32 %v511_v13, %v58_v12  ;;  %v512_v17 = vld [vmem:[%s1184_s1 + $0x30] ss:$0 sm:$0xff] }
  0x30   :  { %439 = vst.msk [vmem:[%s1185_s2 + $0x56] sm:$0x3] %vm395_vm0, %v374_v5  ;;  %v60_v18 = vld [vmem:[%s1183_s0 + $0x62] sm:$0x3]  ;;  %v513_v19 = vld [vmem:[%s1184_s1 + $0x31] ss:$0 sm:$0xff]  ;;  %v379_v21 = vadd.f32 %v512_v17, %v59_v15 }
  0x31   :  { %440 = vst.msk [vmem:[%s1185_s2 + $0x58] sm:$0x3] %vm395_vm0, %v375_v8  ;;  %v61_v20 = vld [vmem:[%s1183_s0 + $0x64] sm:$0x3]  ;;  %v514_v22 = vld [vmem:[%s1184_s1 + $0x32] ss:$0 sm:$0xff]  ;;  %v380_v23 = vadd.f32 %v513_v19, %v60_v18 }
  0x32   :  { %441 = vst.msk [vmem:[%s1185_s2 + $0x5a] sm:$0x3] %vm395_vm0, %v376_v10  ;;  %v62_v24 = vld [vmem:[%s1183_s0 + $0x66] sm:$0x3]  ;;  %v515_v25 = vld [vmem:[%s1184_s1 + $0x33] ss:$0 sm:$0xff]  ;;  %v381_v26 = vadd.f32 %v514_v22, %v61_v20 }
  0x33   :  { %442 = vst.msk [vmem:[%s1185_s2 + $0x5c] sm:$0x3] %vm395_vm0, %v377_v14  ;;  %v63_v27 = vld [vmem:[%s1183_s0 + $0x68] sm:$0x3]  ;;  %v382_v28 = vadd.f32 %v515_v25, %v62_v24  ;;  %v516_v29 = vld [vmem:[%s1184_s1 + $0x34] ss:$0 sm:$0xff] }
  0x34   :  { %443 = vst.msk [vmem:[%s1185_s2 + $0x5e] sm:$0x3] %vm395_vm0, %v378_v16  ;;  %v64_v30 = vld [vmem:[%s1183_s0 + $0x6a] sm:$0x3]  ;;  %v517_v31 = vld [vmem:[%s1184_s1 + $0x35] ss:$0 sm:$0xff]  ;;  %v383_v32 = vadd.f32 %v516_v29, %v63_v27 }
  0x35   :  { %444 = vst.msk [vmem:[%s1185_s2 + $0x60] sm:$0x3] %vm395_vm0, %v379_v21  ;;  %v65_v33 = vld [vmem:[%s1183_s0 + $0x6c] sm:$0x3]  ;;  %v384_v34 = vadd.f32 %v517_v31, %v64_v30  ;;  %v518_v35 = vld [vmem:[%s1184_s1 + $0x36] ss:$0 sm:$0xff] }
  0x36   :  { %445 = vst.msk [vmem:[%s1185_s2 + $0x62] sm:$0x3] %vm395_vm0, %v380_v23  ;;  %v66_v36 = vld [vmem:[%s1183_s0 + $0x6e] sm:$0x3]  ;;  %v519_v37 = vld [vmem:[%s1184_s1 + $0x37] ss:$0 sm:$0xff]  ;;  %v385_v39 = vadd.f32 %v518_v35, %v65_v33 }
  0x37   :  { %446 = vst.msk [vmem:[%s1185_s2 + $0x64] sm:$0x3] %vm395_vm0, %v381_v26  ;;  %v67_v38 = vld [vmem:[%s1183_s0 + $0x70] sm:$0x3]  ;;  %v520_v40 = vld [vmem:[%s1184_s1 + $0x38] ss:$0 sm:$0xff]  ;;  %v386_v41 = vadd.f32 %v519_v37, %v66_v36 }
  0x38   :  { %447 = vst.msk [vmem:[%s1185_s2 + $0x66] sm:$0x3] %vm395_vm0, %v382_v28  ;;  %v68_v42 = vld [vmem:[%s1183_s0 + $0x72] sm:$0x3]  ;;  %v521_v43 = vld [vmem:[%s1184_s1 + $0x39] ss:$0 sm:$0xff]  ;;  %v387_v44 = vadd.f32 %v520_v40, %v67_v38 }
  0x39   :  { %448 = vst.msk [vmem:[%s1185_s2 + $0x68] sm:$0x3] %vm395_vm0, %v383_v32  ;;  %v69_v45 = vld [vmem:[%s1183_s0 + $0x74] sm:$0x3]  ;;  %v388_v46 = vadd.f32 %v521_v43, %v68_v42  ;;  %v522_v47 = vld [vmem:[%s1184_s1 + $0x3a] ss:$0 sm:$0xff] }
  0x3a   :  { %449 = vst.msk [vmem:[%s1185_s2 + $0x6a] sm:$0x3] %vm395_vm0, %v384_v34  ;;  %v70_v48 = vld [vmem:[%s1183_s0 + $0x76] sm:$0x3]  ;;  %v523_v49 = vld [vmem:[%s1184_s1 + $0x3b] ss:$0 sm:$0xff]  ;;  %v389_v50 = vadd.f32 %v522_v47, %v69_v45 }
  0x3b   :  { %450 = vst.msk [vmem:[%s1185_s2 + $0x6c] sm:$0x3] %vm395_vm0, %v385_v39  ;;  %v71_v51 = vld [vmem:[%s1183_s0 + $0x78] sm:$0x3]  ;;  %v390_v52 = vadd.f32 %v523_v49, %v70_v48  ;;  %v524_v53 = vld [vmem:[%s1184_s1 + $0x3c] ss:$0 sm:$0xff] }
  0x3c   :  { %451 = vst.msk [vmem:[%s1185_s2 + $0x6e] sm:$0x3] %vm395_vm0, %v386_v41  ;;  %v72_v54 = vld [vmem:[%s1183_s0 + $0x7a] sm:$0x3]  ;;  %v525_v55 = vld [vmem:[%s1184_s1 + $0x3d] ss:$0 sm:$0xff]  ;;  %v391_v57 = vadd.f32 %v524_v53, %v71_v51 }
  0x3d   :  { %452 = vst.msk [vmem:[%s1185_s2 + $0x70] sm:$0x3] %vm395_vm0, %v387_v44  ;;  %v73_v56 = vld [vmem:[%s1183_s0 + $0x7c] sm:$0x3]  ;;  %v526_v58 = vld [vmem:[%s1184_s1 + $0x3e] ss:$0 sm:$0xff]  ;;  %v392_v59 = vadd.f32 %v525_v55, %v72_v54 }
  0x3e   :  { %453 = vst.msk [vmem:[%s1185_s2 + $0x72] sm:$0x3] %vm395_vm0, %v388_v46  ;;  %v74_v60 = vld [vmem:[%s1183_s0 + $0x7e] sm:$0x3]  ;;  %v393_v62 = vadd.f32 %v526_v58, %v73_v56 }
  0x3f   :  { %454 = vst.msk [vmem:[%s1185_s2 + $0x74] sm:$0x3] %vm395_vm0, %v389_v50  ;;  %v527_v61 = vld [vmem:[%s1184_s1 + $0x3f] ss:$0 sm:$0xff] }
  0x40   :  { %455 = vst.msk [vmem:[%s1185_s2 + $0x76] sm:$0x3] %vm395_vm0, %v390_v52  ;;  %v394_v63 = vadd.f32 %v527_v61, %v74_v60 }
  0x41   :  { %456 = vst.msk [vmem:[%s1185_s2 + $0x78] sm:$0x3] %vm395_vm0, %v391_v57 }
  0x42   :  { %457 = vst.msk [vmem:[%s1185_s2 + $0x7a] sm:$0x3] %vm395_vm0, %v392_v59 }
  0x43   :  { %458 = vst.msk [vmem:[%s1185_s2 + $0x7c] sm:$0x3] %vm395_vm0, %v393_v62 }
  0x44   :  { %459 = vst.msk [vmem:[%s1185_s2 + $0x7e] sm:$0x3] %vm395_vm0, %v394_v63 }

</bundles_post_ra>
